<compile_context>
chip_gen: v6e
topology: v6e:2x2x1
jax: 0.10.0
libtpu: 0.0.40
codegen_flags: <defaults>
</compile_context>

<pallas_src>
import functools
import math

import jax
import jax.numpy as jnp
from jax.experimental import pallas as pl
from jax.experimental.pallas import tpu as pltpu


def _lambertian_kernel(rd_ref, sn_ref, sel_ref, o_ref):
    # rd_ref / sn_ref: (rt, d*128) AoS-interleaved components, fully dense.
    # sel_ref: (d*128, 128) constant 0/1 selection matrix (bf16, resident).
    # o_ref: (rt, 128) -- one output value per pixel.
    a = rd_ref[...].astype(jnp.float32)
    b = sn_ref[...].astype(jnp.float32)
    prod = a * b  # dense VPU multiply on whole 8x128 vregs

    # Exact 3-way bf16 split of the f32 product (Sterbenz: subtractions are
    # exact), so the bf16 MXU reduction with a 0/1 matrix and f32 accumulation
    # reproduces f32 precision (~2^-24 relative error).
    h1 = prod.astype(jnp.bfloat16)
    r1 = prod - h1.astype(jnp.float32)
    h2 = r1.astype(jnp.bfloat16)
    h3 = (r1 - h2.astype(jnp.float32)).astype(jnp.bfloat16)

    sel = sel_ref[...]
    acc = jnp.dot(h1, sel, preferred_element_type=jnp.float32)
    acc = acc + jnp.dot(h2, sel, preferred_element_type=jnp.float32)
    acc = acc + jnp.dot(h3, sel, preferred_element_type=jnp.float32)

    # Negate on the reduced (rt, 128) slab (cheaper than on the (rt, 384) one).
    o_ref[...] = jnp.clip(-acc, 0.0, 1.0).astype(o_ref.dtype)


@functools.partial(jax.jit, static_argnames=("max_rows",))
def lambertian_shader(ray_directions, surface_normals, *, max_rows=2048):
    assert ray_directions.shape == surface_normals.shape
    orig_shape = ray_directions.shape
    d = orig_shape[-1]
    n = math.prod(orig_shape[:-1])
    dtype = ray_directions.dtype
    lanes = d * 128  # one row = 128 interleaved pixels

    # Free (metadata-only) flatten; the AoS order is p-major, component-minor.
    rd = ray_directions.reshape(-1)
    sn = surface_normals.reshape(-1)

    # Pad the pixel count to a multiple of 128 so the (M, d*128) view exists.
    # (Rare path; costs one extra pass only when n % 128 != 0.)
    n_pad = ((n + 127) // 128) * 128
    if n_pad != n:
        pad = (n_pad - n) * d
        rd = jnp.pad(rd, (0, pad))
        sn = jnp.pad(sn, (0, pad))
    m = n_pad // 128

    rd2 = rd.reshape(m, lanes)
    sn2 = sn.reshape(m, lanes)

    # Constant 0/1 selection matrix: S[j, q] = 1 iff j // d == q.
    sel = (jnp.arange(lanes)[:, None] // d == jnp.arange(128)[None, :]).astype(
        jnp.bfloat16
    )

    # Row-tile size: as large as VMEM comfortably allows, but always >= 2 grid
    # steps when possible so v7x's two TensorCores both get tiles.
    if m <= 8:
        rt = m  # full-dim block (legal even when m < 8)
    else:
        rt = min(max_rows, ((pl.cdiv(m, 2) + 7) // 8) * 8)
    grid = (pl.cdiv(m, rt),)

    out2 = pl.pallas_call(
        _lambertian_kernel,
        out_shape=jax.ShapeDtypeStruct((m, 128), dtype),
        grid_spec=pltpu.PrefetchScalarGridSpec(
            num_scalar_prefetch=0,
            grid=grid,
            in_specs=[
                pl.BlockSpec((rt, lanes), lambda i: (i, 0)),
                pl.BlockSpec((rt, lanes), lambda i: (i, 0)),
                # Selection matrix: same block every step -> stays resident.
                pl.BlockSpec((lanes, 128), lambda i: (0, 0)),
            ],
            out_specs=pl.BlockSpec((rt, 128), lambda i: (i, 0)),
        ),
        compiler_params=pltpu.CompilerParams(
            dimension_semantics=("parallel",),
            # ~24 MiB worst case (pipeline buffers + live temporaries) at
            # rt=2048; 48 MiB leaves headroom yet fits v7x's 64 MiB VMEM.
            vmem_limit_bytes=48 * 1024 * 1024,
        ),
    )(rd2, sn2, sel)

    out = out2.reshape(-1)
    if n_pad != n:
        out = out[:n]
    return out.reshape(orig_shape[:-1] + (1,))


def _reference(ray_directions, surface_normals):
    return jnp.clip(
        -(ray_directions * surface_normals).sum(axis=-1, keepdims=True), 0.0, 1.0
    )


if __name__ == "__main__":
    key = jax.random.PRNGKey(0)
    k1, k2 = jax.random.split(key)

    # Rays / normals: batch=2, 16x16 image, 3-vector per pixel.
    shape = (2, 16, 16, 3)
    ray_directions = jax.random.normal(k1, shape, dtype=jnp.float32)
    ray_directions = ray_directions / jnp.linalg.norm(
        ray_directions, axis=-1, keepdims=True
    )
    surface_normals = jax.random.normal(k2, shape, dtype=jnp.float32)
    surface_normals = surface_normals / jnp.linalg.norm(
        surface_normals, axis=-1, keepdims=True
    )

    out = lambertian_shader(ray_directions, surface_normals)
    out = jax.block_until_ready(out)

    ref = _reference(ray_directions, surface_normals)
    assert out.shape == shape[:-1] + (1,), out.shape
    assert jnp.allclose(out, ref, atol=1e-6, rtol=1e-6), "mismatch vs reference"

    print("KERNEL_OK")
</pallas_src>

<mosaic_0001>
module attributes {stable_mosaic.version = 11 : i64} {
  func.func @_lambertian_kernel(%arg0: i32, %arg1: memref<4x384xf32, #tpu.memory_space<vmem>>, %arg2: memref<4x384xf32, #tpu.memory_space<vmem>>, %arg3: memref<384x128xbf16, #tpu.memory_space<vmem>>, %arg4: memref<4x128xf32, #tpu.memory_space<vmem>>) attributes {dimension_semantics = [#tpu.dimension_semantics<parallel>], iteration_bounds = array<i64: 1>, scalar_prefetch = 0 : i64, scratch_operands = 0 : i64, tpu.core_type = #tpu.core_type<tc>, window_params = [{transform_indices = @transform_0, window_bounds = array<i64: 4, 384>}, {transform_indices = @transform_1, window_bounds = array<i64: 4, 384>}, {pipeline_mode = #tpu.pipeline_mode<synchronous>, transform_indices = @transform_2, window_bounds = array<i64: 384, 128>}, {transform_indices = @transform_3, window_bounds = array<i64: 4, 128>}]} {
    %c0 = arith.constant 0 : index
    %c0_0 = arith.constant 0 : index
    %0 = vector.load %arg1[%c0, %c0_0] : memref<4x384xf32, #tpu.memory_space<vmem>>, vector<4x384xf32>
    %c0_1 = arith.constant 0 : index
    %c0_2 = arith.constant 0 : index
    %1 = vector.load %arg2[%c0_1, %c0_2] : memref<4x384xf32, #tpu.memory_space<vmem>>, vector<4x384xf32>
    %2 = arith.mulf %0, %1 : vector<4x384xf32>
    %3 = arith.truncf %2 : vector<4x384xf32> to vector<4x384xbf16>
    %4 = arith.extf %3 : vector<4x384xbf16> to vector<4x384xf32>
    %5 = arith.subf %2, %4 : vector<4x384xf32>
    %6 = arith.truncf %5 : vector<4x384xf32> to vector<4x384xbf16>
    %7 = arith.extf %6 : vector<4x384xbf16> to vector<4x384xf32>
    %8 = arith.subf %5, %7 : vector<4x384xf32>
    %9 = arith.truncf %8 : vector<4x384xf32> to vector<4x384xbf16>
    %c0_3 = arith.constant 0 : index
    %c0_4 = arith.constant 0 : index
    %10 = vector.load %arg3[%c0_3, %c0_4] : memref<384x128xbf16, #tpu.memory_space<vmem>>, vector<384x128xbf16>
    %cst = arith.constant dense<0.000000e+00> : vector<4x128xf32>
    %11 = tpu.matmul %3, %10, %cst {dimension_numbers = #tpu.dot_dimension_numbers<[1], [0], [0], [1], [0, 0, 1, 1], [], []>} : vector<4x384xbf16>, vector<384x128xbf16>, vector<4x128xf32> -> vector<4x128xf32>
    %cst_5 = arith.constant dense<0.000000e+00> : vector<4x128xf32>
    %12 = tpu.matmul %6, %10, %cst_5 {dimension_numbers = #tpu.dot_dimension_numbers<[1], [0], [0], [1], [0, 0, 1, 1], [], []>} : vector<4x384xbf16>, vector<384x128xbf16>, vector<4x128xf32> -> vector<4x128xf32>
    %13 = arith.addf %11, %12 : vector<4x128xf32>
    %cst_6 = arith.constant dense<0.000000e+00> : vector<4x128xf32>
    %14 = tpu.matmul %9, %10, %cst_6 {dimension_numbers = #tpu.dot_dimension_numbers<[1], [0], [0], [1], [0, 0, 1, 1], [], []>} : vector<4x384xbf16>, vector<384x128xbf16>, vector<4x128xf32> -> vector<4x128xf32>
    %15 = arith.addf %13, %14 : vector<4x128xf32>
    %cst_7 = arith.constant 0.000000e+00 : f32
    %16 = vector.broadcast %cst_7 : f32 to vector<4x128xf32>
    %17 = arith.subf %16, %15 : vector<4x128xf32>
    %cst_8 = arith.constant 0.000000e+00 : f32
    %cst_9 = arith.constant 1.000000e+00 : f32
    %18 = vector.broadcast %cst_8 : f32 to vector<4x128xf32>
    %19 = arith.maximumf %18, %17 : vector<4x128xf32>
    %20 = vector.broadcast %cst_9 : f32 to vector<4x128xf32>
    %21 = arith.minimumf %20, %19 : vector<4x128xf32>
    %c0_10 = arith.constant 0 : index
    %c0_11 = arith.constant 0 : index
    %22 = vector.load %arg4[%c0_10, %c0_11] : memref<4x128xf32, #tpu.memory_space<vmem>>, vector<4x128xf32>
    tpu.vector_store %arg4[%c0_10, %c0_11], %21 {strides = array<i32>} : memref<4x128xf32, #tpu.memory_space<vmem>>, vector<4x128xf32>,
    return
  }
  func.func @transform_0(%arg0: i32) -> (i32, i32) {
    %c0_i32 = arith.constant 0 : i32
    %c0_i32_0 = arith.constant 0 : i32
    return %arg0, %c0_i32 : i32, i32
  }
  func.func @transform_1(%arg0: i32) -> (i32, i32) {
    %c0_i32 = arith.constant 0 : i32
    %c0_i32_0 = arith.constant 0 : i32
    return %arg0, %c0_i32 : i32, i32
  }
  func.func @transform_2(%arg0: i32) -> (i32, i32) {
    %c0_i32 = arith.constant 0 : i32
    %c0_i32_0 = arith.constant 0 : i32
    %c0_i32_1 = arith.constant 0 : i32
    return %c0_i32, %c0_i32_0 : i32, i32
  }
  func.func @transform_3(%arg0: i32) -> (i32, i32) {
    %c0_i32 = arith.constant 0 : i32
    %c0_i32_0 = arith.constant 0 : i32
    return %arg0, %c0_i32 : i32, i32
  }
}

</mosaic_0001>

<bundles_post_ra>
// kernel: lambertian_shader.1
= control target key start
LH: loop header
LB: loop body
LE: loop exit
PB: predicated region body
PF: predicated region fallthrough
CT: control target
= control target key end

     0   :  { %v701_v0 = vmov 0.0   ;;  %vm702_vm0 = vmmov 0   ;;  %s973_s2 = inlined_call_operand.vmem [shape: bf16[384,128], index: 2, kind: input, shape index: {}]   ;;  %s974_s0 = inlined_call_operand.vmem [shape: f32[4,384], index: 0, kind: input, shape index: {}]   ;;  %s975_s1 = inlined_call_operand.vmem [shape: f32[4,384], index: 1, kind: input, shape index: {}]   ;;  %s976_s3 = inlined_call_operand.vmem [shape: f32[4,128], index: 3, kind: output, shape index: {}]  }
   0x1   :  { %615 = vmatprep.subr.bf16.mxu1 %v701_v0  ;;  %v727_v1 = vld [vmem:[%s973_s2 + $0x78] sm:$0xff]   ;;  %631 = vmatprep.mubr.msk.bf16.mxu1 %vm702_vm0, %v701_v0  ;;  %v746_v4 = vld [vmem:[%s973_s2 + $0x70] sm:$0xff]   ;;  %v764_v7 = vld [vmem:[%s973_s2 + $0x68] sm:$0xff]  }
   0x2   :  { %v734_v2 = vld [vmem:[%s973_s2 + $0xb8] sm:$0xff]   ;;  %522 = vmatprep.subr.bf16.mxu0 %v727_v1  ;;  %v753_v5 = vld [vmem:[%s973_s2 + $0xb0] sm:$0xff]   ;;  %v770_v8 = vld [vmem:[%s973_s2 + $0xa8] sm:$0xff]  }
   0x3   :  { %v740_v3 = vld [vmem:[%s973_s2 + $0x38] sm:$0xff]   ;;  %616 = vmatpush3.bf16.msra.mxu1 %v734_v2  ;;  %v759_v6 = vld [vmem:[%s973_s2 + $0x30] sm:$0xff]   ;;  %v777_v9 = vld [vmem:[%s973_s2 + $0x28] sm:$0xff]  }
   0x4   :  { %523 = vmatpush3.bf16.msra.mxu0 %v740_v3  ;;  %617 = vmatprep.subr.bf16.mxu1 %v701_v0  ;;  %v783_v10 = vld [vmem:[%s973_s2 + $0x60] sm:$0xff]   ;;  %v802_v13 = vld [vmem:[%s973_s2 + $0x58] sm:$0xff]   ;;  %v821_v16 = vld [vmem:[%s973_s2 + $0x50] sm:$0xff]  }
   0x5   :  { %524 = vmatprep.subr.bf16.mxu0 %v746_v4  ;;  %v789_v11 = vld [vmem:[%s973_s2 + $0xa0] sm:$0xff]   ;;  %v808_v14 = vld [vmem:[%s973_s2 + $0x98] sm:$0xff]   ;;  %v827_v17 = vld [vmem:[%s973_s2 + $0x90] sm:$0xff]  }
   0x6   :  { %v796_v12 = vld [vmem:[%s973_s2 + $0x20] sm:$0xff]   ;;  %v815_v15 = vld [vmem:[%s973_s2 + $0x18] sm:$0xff]   ;;  %v834_v18 = vld [vmem:[%s973_s2 + $0x10] sm:$0xff]  }
   0x7   :  { %618 = vmatpush3.bf16.msra.mxu1 %v753_v5  ;;  %v840_v19 = vld [vmem:[%s973_s2 + $0x48] sm:$0xff]   ;;  %v15_v22 = vld [vmem:[%s974_s0] sm:$0xff] }
   0x8   :  { %525 = vmatpush3.bf16.msra.mxu0 %v759_v6  ;;  %619 = vmatprep.subr.bf16.mxu1 %v701_v0  ;;  %v845_v20 = vld [vmem:[%s973_s2 + $0x88] sm:$0xff]   ;;  %v17_v23 = vld [vmem:[%s975_s1] sm:$0xff] }
   0x9   :  { %526 = vmatprep.subr.bf16.mxu0 %v764_v7  ;;  %v851_v21 = vld [vmem:[%s973_s2 + $0x8] sm:$0xff]   ;;  %v868_v25 = vld [vmem:[%s973_s2 + $0x40] sm:$0xff]   ;;  %v19_v26 = vmul.f32 %v17_v23, %v15_v22 }
   0xa   :  { %v16_v24 = vld [vmem:[%s974_s0 + $0x8] sm:$0xf]  ;;  %v877_v29 = vld [vmem:[%s973_s2 + $0x80] sm:$0xff]  }
   0xb   :  { %620 = vmatpush3.bf16.msra.mxu1 %v770_v8  ;;  %v18_v27 = vld [vmem:[%s975_s1 + $0x8] sm:$0xf]  ;;  %v22_v30 = vcombine.high %v19_v26, %v19_v26  ;;  %v879_v31 = vpack.c.bf16 %v19_v26, %v19_v26  ;;  %v886_v32 = vld [vmem:[%s973_s2] sm:$0xff]  }
   0xc   :  { %527 = vmatpush3.bf16.msra.mxu0 %v777_v9  ;;  %621 = vmatprep.subr.bf16.mxu1 %v701_v0  ;;  %v20_v28 = vmul.f32 %v18_v27, %v16_v24 }
   0xd   :  { %528 = vmatprep.subr.bf16.mxu0 %v783_v10  ;;  %v25_v34 = vpack.c.bf16 %v22_v30, %v22_v30  ;;  %v27_v35 = vunpack.c.l.bf16 %v879_v31 }
   0xe   :  { %v26_v33 = vpack.c.bf16 %v20_v28, %v20_v28 }
   0xf   :  { %622 = vmatpush3.bf16.msra.mxu1 %v789_v11  ;;  %v28_v37 = vunpack.c.l.bf16 %v25_v34 }
  0x10   :  { %529 = vmatpush3.bf16.msra.mxu0 %v796_v12  ;;  %623 = vmatprep.subr.bf16.mxu1 %v701_v0  ;;  %v29_v36 = vunpack.c.l.bf16 %v26_v33 }
  0x11   :  { %530 = vmatprep.subr.bf16.mxu0 %v802_v13  ;;  %v32_v39 = vcombine.low %v27_v35, %v28_v37 }
  0x12   :  { %v892_v38 = vsub.f32 %v20_v28, %v29_v36 }
  0x13   :  { %624 = vmatpush3.bf16.msra.mxu1 %v808_v14  ;;  %v34_v41 = vsub.f32 %v19_v26, %v32_v39 }
  0x14   :  { %531 = vmatpush3.bf16.msra.mxu0 %v815_v15  ;;  %625 = vmatprep.subr.bf16.mxu1 %v701_v0  ;;  %v898_v40 = vpack.c.bf16 %v892_v38, %v892_v38 }
  0x15   :  { %532 = vmatprep.subr.bf16.mxu0 %v821_v16  ;;  %v37_v42 = vcombine.high %v34_v41, %v34_v41  ;;  %v39_v43 = vpack.c.bf16 %v34_v41, %v34_v41 }
  0x16   :  { %v44_v51 = vunpack.c.l.bf16 %v898_v40 }
  0x17   :  { %626 = vmatpush3.bf16.msra.mxu1 %v827_v17  ;;  %v40_v44 = vpack.c.bf16 %v37_v42, %v37_v42  ;;  %v42_v46 = vunpack.c.l.bf16 %v39_v43 }
  0x18   :  { %533 = vmatpush3.bf16.msra.mxu0 %v834_v18  ;;  %627 = vmatprep.subr.bf16.mxu1 %v701_v0  ;;  %v50_v52 = vsub.f32 %v892_v38, %v44_v51 }
  0x19   :  { %534 = vmatprep.subr.bf16.mxu0 %v840_v19  ;;  %281 = vmatprep.mubr.bf16.mxu0 %v40_v44  ;;  %v43_v45 = vunpack.c.l.bf16 %v40_v44 }
  0x1a   :  { %v56_v53 = vpack.c.bf16 %v50_v52, %v50_v52 }
  0x1b   :  { %628 = vmatpush3.bf16.msra.mxu1 %v845_v20  ;;  %v47_v47 = vcombine.low %v42_v46, %v43_v45 }
  0x1c   :  { %535 = vmatpush3.bf16.msra.mxu0 %v851_v21  ;;  %629 = vmatprep.subr.bf16.mxu1 %v701_v0 }
  0x1d   :  { %536 = vmatprep.subr.bf16.mxu0 %v868_v25  ;;  %v49_v48 = vsub.f32 %v34_v41, %v47_v47 }
  0x1f   :  { %630 = vmatpush3.bf16.msra.mxu1 %v877_v29  ;;  %v52_v49 = vcombine.high %v49_v48, %v49_v48  ;;  %v54_v54 = vpack.c.bf16 %v49_v48, %v49_v48 }
  0x20   :  { %537 = vmatpush3.bf16.msra.mxu0 %v886_v32  ;;  %635 = vmatprep.subr.bf16.mxu1 %v701_v0 }
  0x21   :  { %553 = vmatprep.subr.bf16.mxu0 %v727_v1  ;;  %v55_v50 = vpack.c.bf16 %v52_v49, %v52_v49 }
  0x22   :  { %632 = vmatmul.mubr.bf16.vlgmr.msra.gmra.mxu1 %v898_v40 }
  0x23   :  { %636 = vmatpush3.bf16.msra.mxu1 %v734_v2  ;;  %651 = vmatprep.mubr.msk.bf16.mxu1 %vm702_vm0, %v701_v0 }
  0x24   :  { %637 = vmatprep.subr.bf16.mxu1 %v701_v0  ;;  %282 = vmatmul.mubr.bf16.vlgmr.msra.gmra.mxu0 %v39_v43 }
  0x25   :  { %554 = vmatpush3.bf16.msra.mxu0 %v740_v3  ;;  %361 = vmatprep.mubr.bf16.mxu0 %v25_v34 }
  0x26   :  { %555 = vmatprep.subr.bf16.mxu0 %v746_v4 }
  0x27   :  { %638 = vmatpush3.bf16.msra.mxu1 %v753_v5 }
  0x28   :  { %639 = vmatprep.subr.bf16.mxu1 %v701_v0 }
  0x29   :  { %556 = vmatpush3.bf16.msra.mxu0 %v759_v6 }
  0x2a   :  { %557 = vmatprep.subr.bf16.mxu0 %v764_v7 }
  0x2b   :  { %640 = vmatpush3.bf16.msra.mxu1 %v770_v8 }
  0x2c   :  { %641 = vmatprep.subr.bf16.mxu1 %v701_v0 }
  0x2d   :  { %558 = vmatpush3.bf16.msra.mxu0 %v777_v9 }
  0x2e   :  { %559 = vmatprep.subr.bf16.mxu0 %v783_v10 }
  0x2f   :  { %642 = vmatpush3.bf16.msra.mxu1 %v789_v11 }
  0x30   :  { %643 = vmatprep.subr.bf16.mxu1 %v701_v0 }
  0x31   :  { %560 = vmatpush3.bf16.msra.mxu0 %v796_v12 }
  0x32   :  { %561 = vmatprep.subr.bf16.mxu0 %v802_v13 }
  0x33   :  { %644 = vmatpush3.bf16.msra.mxu1 %v808_v14 }
  0x34   :  { %645 = vmatprep.subr.bf16.mxu1 %v701_v0 }
  0x35   :  { %562 = vmatpush3.bf16.msra.mxu0 %v815_v15 }
  0x36   :  { %563 = vmatprep.subr.bf16.mxu0 %v821_v16 }
  0x37   :  { %646 = vmatpush3.bf16.msra.mxu1 %v827_v17 }
  0x38   :  { %647 = vmatprep.subr.bf16.mxu1 %v701_v0 }
  0x39   :  { %564 = vmatpush3.bf16.msra.mxu0 %v834_v18 }
  0x3a   :  { %565 = vmatprep.subr.bf16.mxu0 %v840_v19 }
  0x3b   :  { %648 = vmatpush3.bf16.msra.mxu1 %v845_v20 }
  0x3c   :  { %649 = vmatprep.subr.bf16.mxu1 %v701_v0 }
  0x3d   :  { %566 = vmatpush3.bf16.msra.mxu0 %v851_v21 }
  0x3e   :  { %567 = vmatprep.subr.bf16.mxu0 %v868_v25 }
  0x3f   :  { %650 = vmatpush3.bf16.msra.mxu1 %v877_v29 }
  0x40   :  { %655 = vmatprep.subr.bf16.mxu1 %v701_v0 }
  0x41   :  { %568 = vmatpush3.bf16.msra.mxu0 %v886_v32 }
  0x42   :  { %652 = vmatmul.mubr.bf16.vlgmr.msra.gmra.mxu1 %v26_v33  ;;  %584 = vmatprep.subr.bf16.mxu0 %v727_v1 }
  0x43   :  { %656 = vmatpush3.bf16.msra.mxu1 %v734_v2  ;;  %671 = vmatprep.mubr.msk.bf16.mxu1 %vm702_vm0, %v701_v0 }
  0x44   :  { %657 = vmatprep.subr.bf16.mxu1 %v701_v0  ;;  %362 = vmatmul.mubr.bf16.vlgmr.msra.gmra.mxu0 %v879_v31 }
  0x45   :  { %585 = vmatpush3.bf16.msra.mxu0 %v740_v3  ;;  %441 = vmatprep.mubr.bf16.mxu0 %v55_v50 }
  0x46   :  { %586 = vmatprep.subr.bf16.mxu0 %v746_v4 }
  0x47   :  { %658 = vmatpush3.bf16.msra.mxu1 %v753_v5 }
  0x48   :  { %659 = vmatprep.subr.bf16.mxu1 %v701_v0 }
  0x49   :  { %587 = vmatpush3.bf16.msra.mxu0 %v759_v6 }
  0x4a   :  { %588 = vmatprep.subr.bf16.mxu0 %v764_v7 }
  0x4b   :  { %660 = vmatpush3.bf16.msra.mxu1 %v770_v8 }
  0x4c   :  { %661 = vmatprep.subr.bf16.mxu1 %v701_v0 }
  0x4d   :  { %589 = vmatpush3.bf16.msra.mxu0 %v777_v9 }
  0x4e   :  { %590 = vmatprep.subr.bf16.mxu0 %v783_v10 }
  0x4f   :  { %662 = vmatpush3.bf16.msra.mxu1 %v789_v11 }
  0x50   :  { %663 = vmatprep.subr.bf16.mxu1 %v701_v0 }
  0x51   :  { %591 = vmatpush3.bf16.msra.mxu0 %v796_v12 }
  0x52   :  { %592 = vmatprep.subr.bf16.mxu0 %v802_v13 }
  0x53   :  { %664 = vmatpush3.bf16.msra.mxu1 %v808_v14 }
  0x54   :  { %665 = vmatprep.subr.bf16.mxu1 %v701_v0 }
  0x55   :  { %593 = vmatpush3.bf16.msra.mxu0 %v815_v15 }
  0x56   :  { %594 = vmatprep.subr.bf16.mxu0 %v821_v16 }
  0x57   :  { %666 = vmatpush3.bf16.msra.mxu1 %v827_v17 }
  0x58   :  { %667 = vmatprep.subr.bf16.mxu1 %v701_v0 }
  0x59   :  { %595 = vmatpush3.bf16.msra.mxu0 %v834_v18 }
  0x5a   :  { %596 = vmatprep.subr.bf16.mxu0 %v840_v19 }
  0x5b   :  { %668 = vmatpush3.bf16.msra.mxu1 %v845_v20 }
  0x5c   :  { %669 = vmatprep.subr.bf16.mxu1 %v701_v0 }
  0x5d   :  { %597 = vmatpush3.bf16.msra.mxu0 %v851_v21 }
  0x5e   :  { %598 = vmatprep.subr.bf16.mxu0 %v868_v25 }
  0x5f   :  { %670 = vmatpush3.bf16.msra.mxu1 %v877_v29 }
  0x61   :  { %599 = vmatpush3.bf16.msra.mxu0 %v886_v32 }
  0x62   :  { %672 = vmatmul.mubr.bf16.vlgmr.msra.gmra.mxu1 %v56_v53 }
  0x64   :  { %442 = vmatmul.mubr.bf16.vlgmr.msra.gmra.mxu0 %v54_v54 }
  0xe2   :  { %v323_v55 = vpop.f32.mrf.mxu1 }
  0xe4   :  { %v633_v56 = vpop.f32.mrf.mxu1  ;;  %v538_v58 = vpop.f32.mrf.mxu0 }
  0xe6   :  { %v326_v57 = vpop.f32.mrf.mxu1  ;;  %v539_v60 = vpop.f32.mrf.mxu0 }
  0xe7   :  { %v540_v8 = vadd.f32 %v539_v60, %v538_v58 }
  0xe8   :  { %v634_v59 = vpop.f32.mrf.mxu1  ;;  %v541_v61 = vpop.f32.mrf.mxu0 }
  0xe9   :  { %v324_v12 = vadd.f32 %v540_v8, %v323_v55 }
  0xea   :  { %v542_v62 = vpop.f32.mrf.mxu0 }
 0x102   :  { %v403_v63 = vpop.f32.mrf.mxu1 }
 0x104   :  { %v653_v0 = vpop.f32.mrf.mxu1  ;;  %v569_v2 = vpop.f32.mrf.mxu0 }
 0x106   :  { %v406_v1 = vpop.f32.mrf.mxu1  ;;  %v570_v4 = vpop.f32.mrf.mxu0 }
 0x107   :  { %v571_v10 = vadd.f32 %v570_v4, %v569_v2 }
 0x108   :  { %v654_v3 = vpop.f32.mrf.mxu1  ;;  %v572_v5 = vpop.f32.mrf.mxu0 }
 0x109   :  { %v364_v15 = vadd.f32 %v571_v10, %v324_v12 }
 0x10a   :  { %v573_v6 = vpop.f32.mrf.mxu0 }
 0x10b   :  { %v404_v19 = vadd.f32 %v403_v63, %v364_v15 }
 0x122   :  { %v483_v7 = vpop.f32.mrf.mxu1 }
 0x124   :  { %v673_v9 = vpop.f32.mrf.mxu1  ;;  %v600_v13 = vpop.f32.mrf.mxu0 }
 0x126   :  { %v486_v11 = vpop.f32.mrf.mxu1  ;;  %v601_v16 = vpop.f32.mrf.mxu0 }
 0x127   :  { %v602_v17 = vadd.f32 %v601_v16, %v600_v13 }
 0x128   :  { %v674_v14 = vpop.f32.mrf.mxu1  ;;  %v603_v18 = vpop.f32.mrf.mxu0 }
 0x129   :  { %v484_v20 = vadd.f32 %v602_v17, %v483_v7 }
 0x12a   :  { %v604_v21 = vpop.f32.mrf.mxu0 }
 0x12b   :  { %v489_v22 = vadd.f32 %v484_v20, %v404_v19 }
 0x12d   :  { %v490_v23 = vsub.f32 0.0, %v489_v22 }
 0x12f   :  { %v491_v24 = vmax.f32 %v490_v23, 0.0 }
 0x131   :  { %v492_v25 = vmin.f32 %v491_v24, 1.0 }
 0x133   :  { %493 = vst [vmem:[%s976_s3] sm:$0xf] %v492_v25 }

</bundles_post_ra>
